<compile_context>
chip_gen: v5e
topology: v5e:2x2
jax: 0.10.0
libtpu: 0.0.40
codegen_flags: <defaults>
</compile_context>

<pallas_src>
import jax
import jax.numpy as jnp
from jax.experimental import pallas as pl
from jax.experimental.pallas import tpu as pltpu

_LANE = 128
_SUBLANE = 8
_MAX_LANES = 2048                 # widest flattened lane dim (16 vregs wide)
_TARGET_BLOCK_BYTES = 1 << 20     # ~1 MiB x-block per grid step
_VMEM_LIMIT_BYTES = 32 * 1024 * 1024


def _add_pe_kernel(x_ref, p_ref, o_ref):
    # Pure VPU elementwise add on a lane-dense (TR, C) tile.
    o_ref[...] = x_ref[...] + p_ref[...]


def make_positional_encoding_table(num_hiddens: int, max_len: int = 1000) -> jnp.ndarray:
    """Deterministically build the sinusoidal table, matching the PyTorch init."""
    pos = jnp.arange(max_len, dtype=jnp.float32)[:, None]                      # (max_len, 1)
    denom = jnp.power(10000.0,
                      jnp.arange(0, num_hiddens, 2, dtype=jnp.float32) / num_hiddens)
    ang = pos / denom                                                          # (max_len, H/2)
    P = jnp.zeros((max_len, num_hiddens), dtype=jnp.float32)
    P = P.at[:, 0::2].set(jnp.sin(ang))
    P = P.at[:, 1::2].set(jnp.cos(ang))
    return P                                                                   # (max_len, H)


def _choose_lane_dim(S: int, H: int):
    """Pick a lane-dense flattening of the per-sequence (S, H) slab.

    Returns (C, p_rows) with p_rows * C == S * H and C a multiple of 128
    whenever possible, so stores are unmasked full-lane vst even when H < 128.
    """
    N = S * H
    if N % _LANE == 0:
        for c in range(min(_MAX_LANES, N), 0, -_LANE):
            if N % c == 0:
                return c, N // c
    # S*H not 128-aligned: keep (S, H) rows; block last dim == full view dim
    # (legal, but tail lanes are masked).
    # TODO(synk): pad H up to a multiple of 128 if this path ever matters.
    return H, S


def _choose_row_tile(R: int, p_rows: int, row_bytes: int) -> int:
    """Row tile: divides R, multiple of 8 sublanes (or equals the full dim),
    aligned with the PE-pattern period, and sized near _TARGET_BLOCK_BYTES."""
    target = max(1, _TARGET_BLOCK_BYTES // max(1, row_bytes))
    divs = set()
    i = 1
    while i * i <= R:
        if R % i == 0:
            divs.add(i)
            divs.add(R // i)
        i += 1
    best = R  # always legal (full dim) and always pattern-aligned
    for t in sorted(divs):
        if t != R and t % _SUBLANE != 0:
            continue
        if t % p_rows != 0 and p_rows % t != 0:
            continue
        if abs(t - target) < abs(best - target):
            best = t
    return best


def positional_encoding_forward(x: jnp.ndarray, P: jnp.ndarray) -> jnp.ndarray:
    """x: (B, S, H); P: (max_len, H) f32 table.  Returns x + P[:S] (broadcast over batch)."""
    B, S, H = x.shape
    if S > P.shape[0]:
        raise ValueError(f"seq_len {S} exceeds max_len {P.shape[0]}")
    dtype = x.dtype
    itemsize = jnp.dtype(dtype).itemsize

    C, p_rows = _choose_lane_dim(S, H)
    R = B * p_rows

    # Glue: slice + cast the table; present lane-dense 2-D views (free reshapes).
    p_pat = P[:S].astype(dtype).reshape(p_rows, C)   # one sequence's PE pattern
    x2d = x.reshape(R, C)

    TR = _choose_row_tile(R, p_rows, C * itemsize)

    cost = pl.CostEstimate(
        flops=B * S * H,
        transcendentals=0,
        bytes_accessed=(2 * B * S * H + S * H) * itemsize,
    )

    if TR % p_rows == 0:
        # Per-sequence pattern fits inside one row tile: pre-tile it into a
        # small (TR, C) slab and keep its block index constant -> Pallas
        # fetches it once and keeps it VMEM-resident for the whole grid.
        p_slab = jnp.tile(p_pat, (TR // p_rows, 1)) if TR != p_rows else p_pat
        out2d = pl.pallas_call(
            _add_pe_kernel,
            out_shape=jax.ShapeDtypeStruct((R, C), dtype),
            grid_spec=pltpu.PrefetchScalarGridSpec(
                num_scalar_prefetch=0,
                grid=(R // TR,),
                in_specs=[
                    pl.BlockSpec((TR, C), lambda r: (r, 0)),
                    pl.BlockSpec((TR, C), lambda r: (0, 0)),   # constant: no re-fetch
                ],
                out_specs=pl.BlockSpec((TR, C), lambda r: (r, 0)),
            ),
            compiler_params=pltpu.CompilerParams(
                dimension_semantics=("parallel",),
                vmem_limit_bytes=_VMEM_LIMIT_BYTES,
            ),
            cost_estimate=cost,
        )(x2d, p_slab)
    else:
        # Per-sequence pattern is larger than one tile (p_rows % TR == 0):
        # tile the pattern too.  Grid = (pattern_tile, batch) with batch as
        # the inner axis so the P block index is constant across it (the
        # pattern tile is fetched k times total, not once per grid step).
        k = p_rows // TR
        out2d = pl.pallas_call(
            _add_pe_kernel,
            out_shape=jax.ShapeDtypeStruct((R, C), dtype),
            grid_spec=pltpu.PrefetchScalarGridSpec(
                num_scalar_prefetch=0,
                grid=(k, B),
                in_specs=[
                    pl.BlockSpec((TR, C), lambda r, b: (b * k + r, 0)),
                    pl.BlockSpec((TR, C), lambda r, b: (r, 0)),
                ],
                out_specs=pl.BlockSpec((TR, C), lambda r, b: (b * k + r, 0)),
            ),
            compiler_params=pltpu.CompilerParams(
                dimension_semantics=("parallel", "parallel"),
                vmem_limit_bytes=_VMEM_LIMIT_BYTES,
            ),
            cost_estimate=cost,
        )(x2d, p_pat)

    return out2d.reshape(B, S, H)


if __name__ == "__main__":
    max_len = 1000
    key = jax.random.PRNGKey(0)

    def _check(batch, seq_len, num_hiddens, dtype, tol):
        kx = jax.random.fold_in(key, batch * 10_000 + seq_len * 100 + num_hiddens)
        x = jax.random.normal(
            kx, (batch, seq_len, num_hiddens), dtype=jnp.float32).astype(dtype)
        P = make_positional_encoding_table(num_hiddens, max_len)
        out = jax.block_until_ready(positional_encoding_forward(x, P))
        ref = x + P[None, :seq_len, :].astype(dtype)
        assert out.shape == x.shape
        assert out.dtype == x.dtype
        assert jnp.allclose(out, ref, atol=tol, rtol=tol), (
            f"mismatch: B={batch} S={seq_len} H={num_hiddens} dtype={dtype}")

    # Small spec-sized case (H=32 < 128 -> flattened to a lane-dense 256-wide view).
    _check(2, 8, 32, jnp.float32, 1e-6)
    # Activation dtype != f32 (table is cast to x.dtype in the wrapper).
    _check(2, 8, 32, jnp.bfloat16, 2e-2)
    # Larger case exercising the tiled path (per-sequence PE slab > one row tile).
    _check(2, 512, 1024, jnp.float32, 1e-6)

    print("KERNEL_OK")
</pallas_src>

<mosaic_0001>
module attributes {stable_mosaic.version = 11 : i64} {
  func.func @_add_pe_kernel(%arg0: i32, %arg1: memref<2x256xf32, #tpu.memory_space<vmem>>, %arg2: memref<2x256xf32, #tpu.memory_space<vmem>>, %arg3: memref<2x256xf32, #tpu.memory_space<vmem>>) attributes {dimension_semantics = [#tpu.dimension_semantics<parallel>], iteration_bounds = array<i64: 1>, scalar_prefetch = 0 : i64, scratch_operands = 0 : i64, tpu.core_type = #tpu.core_type<tc>, window_params = [{transform_indices = @transform_0, window_bounds = array<i64: 2, 256>}, {pipeline_mode = #tpu.pipeline_mode<synchronous>, transform_indices = @transform_1, window_bounds = array<i64: 2, 256>}, {transform_indices = @transform_2, window_bounds = array<i64: 2, 256>}]} {
    %c0 = arith.constant 0 : index
    %c0_0 = arith.constant 0 : index
    %0 = vector.load %arg1[%c0, %c0_0] : memref<2x256xf32, #tpu.memory_space<vmem>>, vector<2x256xf32>
    %c0_1 = arith.constant 0 : index
    %c0_2 = arith.constant 0 : index
    %1 = vector.load %arg2[%c0_1, %c0_2] : memref<2x256xf32, #tpu.memory_space<vmem>>, vector<2x256xf32>
    %2 = arith.addf %0, %1 : vector<2x256xf32>
    %c0_3 = arith.constant 0 : index
    %c0_4 = arith.constant 0 : index
    %3 = vector.load %arg3[%c0_3, %c0_4] : memref<2x256xf32, #tpu.memory_space<vmem>>, vector<2x256xf32>
    tpu.vector_store %arg3[%c0_3, %c0_4], %2 {strides = array<i32>} : memref<2x256xf32, #tpu.memory_space<vmem>>, vector<2x256xf32>,
    return
  }
  func.func @transform_0(%arg0: i32) -> (i32, i32) {
    %c0_i32 = arith.constant 0 : i32
    %c0_i32_0 = arith.constant 0 : i32
    return %arg0, %c0_i32 : i32, i32
  }
  func.func @transform_1(%arg0: i32) -> (i32, i32) {
    %c0_i32 = arith.constant 0 : i32
    %c0_i32_0 = arith.constant 0 : i32
    %c0_i32_1 = arith.constant 0 : i32
    return %c0_i32, %c0_i32_0 : i32, i32
  }
  func.func @transform_2(%arg0: i32) -> (i32, i32) {
    %c0_i32 = arith.constant 0 : i32
    %c0_i32_0 = arith.constant 0 : i32
    return %arg0, %c0_i32 : i32, i32
  }
}

</mosaic_0001>

<bundles_post_ra>
// kernel: tpu_custom_call.1
= control target key start
LH: loop header
LB: loop body
LE: loop exit
PB: predicated region body
PF: predicated region fallthrough
CT: control target
= control target key end

     0   :  { %7 = vsyncpa [#allocation3], 0  ;;  %s170_s0 = inlined_call_operand.hbm [shape: f32[2,256], index: 0, kind: input, shape index: {}]   ;;  %s171_s1 = inlined_call_operand.hbm [shape: f32[2,256], index: 1, kind: input, shape index: {}]   ;;  %s172_s2 = inlined_call_operand.hbm [shape: f32[2,256], index: 2, kind: output, shape index: {}]  }
   0x1   :  { %8 = vsyncpa [#allocation6], 0 }
   0x2   :  { %9 = vsyncpa [#allocation4], 0  ;;  %s15_s11 = sshll.u32 %s170_s0, 4  ;;  %s143_s12 = smov [#allocation2]   ;;  %s16_s11 = int_to_ptr.hbm [resolvable:$true] %s15_s11 }
   0x3   :  { %s17_s13 = sshll.u32 %s143_s12, 4  ;;  %s26_s16 = sshll.u32 %s171_s1, 4  ;;  %s18_s13 = int_to_ptr.vmem [resolvable:$true] %s17_s13  ;;  %s27_s16 = int_to_ptr.hbm [resolvable:$true] %s26_s16 }
   0x4   :  { %20 = dma.hbm_to_vmem [thread:$0]  %s16_s11, 64, %s18_s13, [#allocation3]  }
   0x5   :  { %s144_s17 = smov [#allocation5]  }
   0x6   :  { %s28_s18 = sshll.u32 %s144_s17, 4  ;;  %s29_s18 = int_to_ptr.vmem [resolvable:$true] %s28_s18 }
   0x7   :  { %31 = dma.hbm_to_vmem [thread:$0]  %s27_s16, 64, %s29_s18, [#allocation6]  }
   0x8   :  { %137 = dma.done.wait [#allocation3], 64  }
   0x9   :  { %138 = vsyncadd [#allocation3], 4294967232 }
   0xa   :  { %139 = dma.done.wait [#allocation6], 64  }
   0xb   :  { %140 = vsyncadd [#allocation6], 4294967232  ;;  %s145_s19 = smov [#allocation7]   ;;  %s51_s22 = sshll.u32 %s172_s2, 4  ;;  %v40_v0 = vld [vmem:[#allocation2] sm:$0xf]  ;;  %s52_s22 = int_to_ptr.hbm [resolvable:$true] %s51_s22 }
   0xc   :  { %s49_s0 = sshll.u32 %s145_s19, 4  ;;  %v41_v1 = vld [vmem:[#allocation5] sm:$0xf]  ;;  %s50_s0 = int_to_ptr.vmem [resolvable:$true] %s49_s0 }
   0xd   :  { %v42_v2 = vadd.f32 %v41_v1, %v40_v0 }
   0xf   :  { %43 = vst [vmem:[#allocation7] sm:$0xf] %v42_v2 }
  0x10   :  { %54 = dma.vmem_to_hbm [thread:$0]  %s50_s0, 64, %s52_s22, [#allocation4]  }
  0x11   :  { %141 = dma.done.wait [#allocation4], 64  }
  0x12   :  { %142 = vsyncadd [#allocation4], 4294967232 }
  0x13   :  { %59 = vsyncpa [#allocation3], 1 }
  0x14   :  { %60 = vsyncpa [#allocation6], 1 }
  0x15   :  { %61 = vsyncpa [#allocation4], 1 }

</bundles_post_ra>
